<compile_context>
chip_gen: v7x
topology: tpu7x:2x2x1
jax: 0.10.0
libtpu: 0.0.40
codegen_flags: <defaults>
</compile_context>

<pallas_src>
import jax
import jax.numpy as jnp
from jax.experimental import pallas as pl
from jax.experimental.pallas import tpu as pltpu


def _round_up(x, m):
    return (x + m - 1) // m * m


def _sage_kernel(a_ref, xs_ref, xd_ref, w_ref, b_ref, o_ref, acc_ref):
    # a_ref  : (TM, TK)          bf16 row-normalized adjacency tile (dst rows i, src cols k)
    # xs_ref : (TK, Fin)         bf16 source-node features   (block indexed by k)
    # xd_ref : (TM, Fin)         bf16 destination-node feats  (block indexed by i)
    # w_ref  : (2*Fin, Fout_pad) bf16 stacked [W_self ; W_neigh]
    # b_ref  : (1, Fout_pad)     f32 bias
    # o_ref  : (TM, Fout_pad)    f32 output tile (lane-dense)
    # acc_ref: (TM, Fin)         f32 neighbor-mean accumulator (VMEM scratch)
    k = pl.program_id(1)

    @pl.when(k == 0)
    def _():
        acc_ref[...] = jnp.zeros_like(acc_ref)

    # Partial neighbor mean: A_tile @ X_src_tile on the MXU, bf16 in / f32 accumulate.
    acc_ref[...] += jnp.dot(
        a_ref[...], xs_ref[...], preferred_element_type=jnp.float32
    )

    @pl.when(k == pl.num_programs(1) - 1)
    def _():
        # Fused projection: [x_dst | neigh_mean] @ [W_self; W_neigh] + bias (one MXU pass).
        z = jnp.concatenate(
            [xd_ref[...], acc_ref[...].astype(jnp.bfloat16)], axis=-1
        )
        out = jnp.dot(z, w_ref[...], preferred_element_type=jnp.float32) + b_ref[...]
        o_ref[...] = out.astype(o_ref.dtype)


def sage_conv_mean(a_norm, x, w_self, w_neigh, bias, *, tm=128, tk=128):
    """Tiled SAGEConv(mean) forward.

    a_norm: (N, N) f32 row-normalized adjacency; x: (N, Fin); w_*: (Fin, Fout); bias: (1, Fout).
    """
    n, f_in = x.shape
    f_out = w_self.shape[1]

    n_pad = _round_up(n, max(tm, tk))
    f_out_pad = _round_up(f_out, 128)  # lane-dense output -> unmasked vector stores

    # bf16 operands for the MXU; zero-padded rows/cols leave real-row results unchanged.
    a_p = jnp.zeros((n_pad, n_pad), jnp.bfloat16).at[:n, :n].set(
        a_norm.astype(jnp.bfloat16))
    x_p = jnp.zeros((n_pad, f_in), jnp.bfloat16).at[:n, :].set(
        x.astype(jnp.bfloat16))
    w_stack = jnp.zeros((2 * f_in, f_out_pad), jnp.bfloat16)
    w_stack = w_stack.at[:f_in, :f_out].set(w_self.astype(jnp.bfloat16))
    w_stack = w_stack.at[f_in:, :f_out].set(w_neigh.astype(jnp.bfloat16))
    b_p = jnp.zeros((1, f_out_pad), jnp.float32).at[:, :f_out].set(
        bias.astype(jnp.float32))

    grid = (n_pad // tm, n_pad // tk)  # (dst-row tiles [parallel], reduction tiles [last])

    out = pl.pallas_call(
        _sage_kernel,
        out_shape=jax.ShapeDtypeStruct((n_pad, f_out_pad), jnp.float32),
        grid_spec=pltpu.PrefetchScalarGridSpec(
            num_scalar_prefetch=0,
            grid=grid,
            in_specs=[
                pl.BlockSpec((tm, tk), lambda i, k: (i, k)),             # A tile
                pl.BlockSpec((tk, f_in), lambda i, k: (k, 0)),           # X (source rows)
                pl.BlockSpec((tm, f_in), lambda i, k: (i, 0)),           # X (dest rows)
                pl.BlockSpec((2 * f_in, f_out_pad), lambda i, k: (0, 0)),  # stacked weights
                pl.BlockSpec((1, f_out_pad), lambda i, k: (0, 0)),       # bias
            ],
            out_specs=pl.BlockSpec((tm, f_out_pad), lambda i, k: (i, 0)),
            scratch_shapes=[pltpu.VMEM((tm, f_in), jnp.float32)],
        ),
        compiler_params=pltpu.CompilerParams(
            dimension_semantics=("parallel", "arbitrary"),
            vmem_limit_bytes=32 * 1024 * 1024,  # explicit, safe on v7x's 64 MiB VMEM
        ),
    )(a_p, x_p, x_p, w_stack, b_p)

    return out[:n, :f_out]


def gn_forward(node_h, src, dst, w_self, w_neigh, bias, num_nodes,
               *, min_pallas_nodes=128):
    """GN.forward: run SAGEConv(mean) on the 'atom_neighbors_atom' edge subgraph and return
    the updated 'h' features (the dgl heterograph container has no numerical content)."""
    # Glue (plain JAX): dense row-normalized adjacency from the edge list.
    adj = jnp.zeros((num_nodes, num_nodes), jnp.float32).at[dst, src].add(1.0)
    deg = adj.sum(axis=1, keepdims=True)
    a_norm = jnp.where(deg > 0, adj / jnp.maximum(deg, 1.0), 0.0)

    if num_nodes < min_pallas_nodes:
        # Tiny graphs: kernel-launch + DMA overhead dominates; let XLA fuse the matmuls.
        return node_h @ w_self + (a_norm @ node_h) @ w_neigh + bias

    # NOTE: if Fout << Fin, a project-first variant (A @ (X @ W_neigh)) does fewer flops on
    # the N^2 contraction; with Fin <= padded Fout the aggregate-first order used here wins.
    return sage_conv_mean(a_norm, node_h, w_self, w_neigh, bias)


if __name__ == "__main__":
    key = jax.random.PRNGKey(0)
    k_x, k_ws, k_wn, k_b, k_e = jax.random.split(key, 5)

    N = 256        # atoms (2x2 tile grid at TM=TK=128)
    IN_FEAT = 128
    OUT_FEAT = 64  # padded to 128 lanes inside the wrapper
    N_EDGES = 2048  # atom_neighbors_atom edges (avg in-degree ~8)

    # Deterministic synthetic parameters (DGL SAGEConv: fc_self, fc_neigh, bias).
    w_self = jax.random.normal(k_ws, (IN_FEAT, OUT_FEAT), jnp.float32) * 0.1
    w_neigh = jax.random.normal(k_wn, (IN_FEAT, OUT_FEAT), jnp.float32) * 0.1
    bias = jax.random.normal(k_b, (1, OUT_FEAT), jnp.float32) * 0.01

    # Node features g.nodes['atom'].data['h'] and a deterministic edge list.
    x = jax.random.normal(k_x, (N, IN_FEAT), jnp.float32)
    edges = jax.random.randint(k_e, (2, N_EDGES), 0, N)
    src, dst = edges[0], edges[1]

    out = gn_forward(x, src, dst, w_self, w_neigh, bias, N)
    out = jax.block_until_ready(out)

    # Pure-JAX reference mirroring the kernel's bf16-operand / f32-accumulate numerics.
    adj = jnp.zeros((N, N), jnp.float32).at[dst, src].add(1.0)
    deg = adj.sum(axis=1, keepdims=True)
    a_norm = jnp.where(deg > 0, adj / jnp.maximum(deg, 1.0), 0.0)
    a_bf = a_norm.astype(jnp.bfloat16).astype(jnp.float32)
    x_bf = x.astype(jnp.bfloat16).astype(jnp.float32)
    ws_bf = w_self.astype(jnp.bfloat16).astype(jnp.float32)
    wn_bf = w_neigh.astype(jnp.bfloat16).astype(jnp.float32)
    neigh = (a_bf @ x_bf).astype(jnp.bfloat16).astype(jnp.float32)
    ref = x_bf @ ws_bf + neigh @ wn_bf + bias
    assert jnp.allclose(out, ref, atol=2e-3, rtol=2e-3), \
        float(jnp.max(jnp.abs(out - ref)))

    # TODO(synk): dgl.to_homo / edge_type_subgraph are graph-container ops with no numerical
    # Pallas equivalent; represented here as the precomputed edge list.
    print("KERNEL_OK")
</pallas_src>

<mosaic_0001>
module attributes {stable_mosaic.version = 11 : i64} {
  func.func @_sage_kernel(%arg0: i32, %arg1: i32, %arg2: memref<128x128xbf16, #tpu.memory_space<vmem>>, %arg3: memref<128x128xbf16, #tpu.memory_space<vmem>>, %arg4: memref<128x128xbf16, #tpu.memory_space<vmem>>, %arg5: memref<256x128xbf16, #tpu.memory_space<vmem>>, %arg6: memref<1x128xf32, #tpu.memory_space<vmem>>, %arg7: memref<128x128xf32, #tpu.memory_space<vmem>>, %arg8: memref<128x128xf32, #tpu.memory_space<vmem>>) attributes {dimension_semantics = [#tpu.dimension_semantics<parallel>, #tpu.dimension_semantics<arbitrary>], iteration_bounds = array<i64: 2, 2>, scalar_prefetch = 0 : i64, scratch_operands = 1 : i64, tpu.core_type = #tpu.core_type<tc>, window_params = [{transform_indices = @transform_0, window_bounds = array<i64: 128, 128>}, {transform_indices = @transform_1, window_bounds = array<i64: 128, 128>}, {transform_indices = @transform_2, window_bounds = array<i64: 128, 128>}, {pipeline_mode = #tpu.pipeline_mode<synchronous>, transform_indices = @transform_3, window_bounds = array<i64: 256, 128>}, {pipeline_mode = #tpu.pipeline_mode<synchronous>, transform_indices = @transform_4, window_bounds = array<i64: 1, 128>}, {transform_indices = @transform_5, window_bounds = array<i64: 128, 128>}]} {
    %c0_i32 = arith.constant 0 : i32
    %0 = arith.cmpi eq, %arg1, %c0_i32 : i32
    %1 = arith.extui %0 : i1 to i32
    %c0_i32_0 = arith.constant 0 : i32
    %2 = arith.cmpi ne, %1, %c0_i32_0 : i32
    scf.if %2 {
      %cst_9 = arith.constant 0.000000e+00 : f32
      %12 = vector.broadcast %cst_9 : f32 to vector<128x128xf32>
      %c0_10 = arith.constant 0 : index
      %c0_11 = arith.constant 0 : index
      %13 = vector.load %arg8[%c0_10, %c0_11] : memref<128x128xf32, #tpu.memory_space<vmem>>, vector<128x128xf32>
      tpu.vector_store %arg8[%c0_10, %c0_11], %12 {strides = array<i32>} : memref<128x128xf32, #tpu.memory_space<vmem>>, vector<128x128xf32>,
    } else {
    }
    %c0 = arith.constant 0 : index
    %c0_1 = arith.constant 0 : index
    %3 = vector.load %arg8[%c0, %c0_1] : memref<128x128xf32, #tpu.memory_space<vmem>>, vector<128x128xf32>
    %c0_2 = arith.constant 0 : index
    %c0_3 = arith.constant 0 : index
    %4 = vector.load %arg2[%c0_2, %c0_3] : memref<128x128xbf16, #tpu.memory_space<vmem>>, vector<128x128xbf16>
    %c0_4 = arith.constant 0 : index
    %c0_5 = arith.constant 0 : index
    %5 = vector.load %arg3[%c0_4, %c0_5] : memref<128x128xbf16, #tpu.memory_space<vmem>>, vector<128x128xbf16>
    %cst = arith.constant dense<0.000000e+00> : vector<128x128xf32>
    %6 = tpu.matmul %4, %5, %cst {dimension_numbers = #tpu.dot_dimension_numbers<[1], [0], [0], [1], [0, 0, 1, 1], [], []>} : vector<128x128xbf16>, vector<128x128xbf16>, vector<128x128xf32> -> vector<128x128xf32>
    %7 = arith.addf %3, %6 : vector<128x128xf32>
    %c0_6 = arith.constant 0 : index
    %c0_7 = arith.constant 0 : index
    %8 = vector.load %arg8[%c0_6, %c0_7] : memref<128x128xf32, #tpu.memory_space<vmem>>, vector<128x128xf32>
    tpu.vector_store %arg8[%c0_6, %c0_7], %7 {strides = array<i32>} : memref<128x128xf32, #tpu.memory_space<vmem>>, vector<128x128xf32>,
    %c1_i32 = arith.constant 1 : i32
    %9 = arith.cmpi eq, %arg1, %c1_i32 : i32
    %10 = arith.extui %9 : i1 to i32
    %c0_i32_8 = arith.constant 0 : i32
    %11 = arith.cmpi ne, %10, %c0_i32_8 : i32
    scf.if %11 {
      %c0_9 = arith.constant 0 : index
      %c0_10 = arith.constant 0 : index
      %12 = vector.load %arg4[%c0_9, %c0_10] : memref<128x128xbf16, #tpu.memory_space<vmem>>, vector<128x128xbf16>
      %c0_11 = arith.constant 0 : index
      %c0_12 = arith.constant 0 : index
      %13 = vector.load %arg8[%c0_11, %c0_12] : memref<128x128xf32, #tpu.memory_space<vmem>>, vector<128x128xf32>
      %14 = arith.truncf %13 : vector<128x128xf32> to vector<128x128xbf16>
      %15 = tpu.concatenate %12, %14 in 1 : vector<128x128xbf16>, vector<128x128xbf16> -> vector<128x256xbf16>
      %c0_13 = arith.constant 0 : index
      %c0_14 = arith.constant 0 : index
      %16 = vector.load %arg5[%c0_13, %c0_14] : memref<256x128xbf16, #tpu.memory_space<vmem>>, vector<256x128xbf16>
      %cst_15 = arith.constant dense<0.000000e+00> : vector<128x128xf32>
      %17 = tpu.matmul %15, %16, %cst_15 {dimension_numbers = #tpu.dot_dimension_numbers<[1], [0], [0], [1], [0, 0, 1, 1], [], []>} : vector<128x256xbf16>, vector<256x128xbf16>, vector<128x128xf32> -> vector<128x128xf32>
      %c0_16 = arith.constant 0 : index
      %c0_17 = arith.constant 0 : index
      %18 = vector.load %arg6[%c0_16, %c0_17] : memref<1x128xf32, #tpu.memory_space<vmem>>, vector<1x128xf32>
      %19 = vector.broadcast %18 : vector<1x128xf32> to vector<128x128xf32>
      %20 = arith.addf %17, %19 : vector<128x128xf32>
      %c0_18 = arith.constant 0 : index
      %c0_19 = arith.constant 0 : index
      %21 = vector.load %arg7[%c0_18, %c0_19] : memref<128x128xf32, #tpu.memory_space<vmem>>, vector<128x128xf32>
      tpu.vector_store %arg7[%c0_18, %c0_19], %20 {strides = array<i32>} : memref<128x128xf32, #tpu.memory_space<vmem>>, vector<128x128xf32>,
    } else {
    }
    return
  }
  func.func @transform_0(%arg0: i32, %arg1: i32) -> (i32, i32) {
    %c0_i32 = arith.constant 0 : i32
    return %arg0, %arg1 : i32, i32
  }
  func.func @transform_1(%arg0: i32, %arg1: i32) -> (i32, i32) {
    %c0_i32 = arith.constant 0 : i32
    %c0_i32_0 = arith.constant 0 : i32
    return %arg1, %c0_i32 : i32, i32
  }
  func.func @transform_2(%arg0: i32, %arg1: i32) -> (i32, i32) {
    %c0_i32 = arith.constant 0 : i32
    %c0_i32_0 = arith.constant 0 : i32
    return %arg0, %c0_i32 : i32, i32
  }
  func.func @transform_3(%arg0: i32, %arg1: i32) -> (i32, i32) {
    %c0_i32 = arith.constant 0 : i32
    %c0_i32_0 = arith.constant 0 : i32
    %c0_i32_1 = arith.constant 0 : i32
    return %c0_i32, %c0_i32_0 : i32, i32
  }
  func.func @transform_4(%arg0: i32, %arg1: i32) -> (i32, i32) {
    %c0_i32 = arith.constant 0 : i32
    %c0_i32_0 = arith.constant 0 : i32
    %c0_i32_1 = arith.constant 0 : i32
    return %c0_i32, %c0_i32_0 : i32, i32
  }
  func.func @transform_5(%arg0: i32, %arg1: i32) -> (i32, i32) {
    %c0_i32 = arith.constant 0 : i32
    %c0_i32_0 = arith.constant 0 : i32
    return %arg0, %c0_i32 : i32, i32
  }
}

</mosaic_0001>

<bundles_post_ra>
// kernel: tpu_custom_call.1
= control target key start
LH: loop header
LB: loop body
LE: loop exit
PB: predicated region body
PF: predicated region fallthrough
CT: control target
= control target key end

     0   :  { %s2394_s0 = inlined_call_operand.hbm [shape: bf16[256,256], index: 0, kind: input, shape index: {}]   ;;  %s2395_s1 = inlined_call_operand.hbm [shape: bf16[256,128], index: 1, kind: input, shape index: {}]   ;;  %s2396_s2 = inlined_call_operand.hbm [shape: bf16[256,128], index: 2, kind: input, shape index: {}]   ;;  %s2397_s3 = inlined_call_operand.hbm [shape: bf16[256,128], index: 3, kind: input, shape index: {}]   ;;  %s2398_s4 = inlined_call_operand.vmem [shape: f32[1,128], index: 4, kind: input, shape index: {}]   ;;  %s2399_s5 = inlined_call_operand.hbm [shape: f32[256,128], index: 5, kind: output, shape index: {}]  }
   0x1   :  { %2417 = sst [smem:[#allocation24_spill]] %s2394_s0 }
   0x2   :  { %2418 = sst [smem:[#allocation25_spill]] %s2395_s1 }
   0x3   :  { %2419 = sst [smem:[#allocation26_spill]] %s2397_s3 }
   0x4   :  { %2420 = sst [smem:[#allocation27_spill]] %s2398_s4 }
   0x5   :  { %2421 = sst [smem:[#allocation28_spill]] %s2399_s5 }
   0x6   :  { %10 = vsyncpa [#allocation4], 0 }
   0x7   :  { %12 = vsyncpa [#allocation4 + $0x1], 0 }
   0x8   :  { %13 = vsyncpa [#allocation7], 0 }
   0x9   :  { %15 = vsyncpa [#allocation7 + $0x1], 0 }
   0xa   :  { %16 = vsyncpa [#allocation10], 0 }
   0xb   :  { %17 = vsyncpa [#allocation5], 0 }
   0xc   :  { %19 = vsyncpa [#allocation5 + $0x1], 0  ;;  %s1871_s18 = smov 0   ;;  %s1873_s19 = smov 0  }
   0xd   :  { %s1875_s20 = smov 0   ;;  %s1877_s21 = smov 0  }
   0xe   :  { %s1879_s22 = smov 0   ;;  %s1881_s23 = smov 0  }
   0xf   :  { %s1883_s24 = smov 0   ;;  %s1885_s25 = smov 0  }
  0x10   :  { %s1887_s26 = smov 0   ;;  %s1889_s27 = smov 0  }
  0x11   :  { %s1891_s28 = smov 0   ;;  %s1893_s29 = smov 0  }
  0x12   :  { %s1895_s30 = smov 0   ;;  %s1897_s6 = smov 0  }
  0x13 LB: > { %2422 = sst [smem:[#allocation17_spill]] %s1796_s23  ;;  %s34_s7 = sadd.s32 1, %s1820_s29  ;;  %s1828_s6 = sphi %s1897_s6, %s25_s6   ;;  %s1824_s30 = sphi %s1895_s30, %s2488_s30   ;;  %s1820_s29 = sphi %s1893_s29, %s2487_s29   ;;  %s1816_s28 = sphi %s1891_s28, %s2486_s28   ;;  %s1812_s27 = sphi %s1889_s27, %s2485_s27   ;;  %s1808_s26 = sphi %s1887_s26, %s2484_s26   ;;  %s1804_s25 = sphi %s1885_s25, %s2483_s25   ;;  %s1800_s24 = sphi %s1883_s24, %s2482_s24   ;;  %s1796_s23 = sphi %s1881_s23, %s2481_s23   ;;  %s1792_s22 = sphi %s1879_s22, %s2480_s22   ;;  %s1788_s21 = sphi %s1877_s21, %s2479_s21   ;;  %s1784_s20 = sphi %s1875_s20, %s2478_s20   ;;  %s1780_s19 = sphi %s1873_s19, %s2477_s19   ;;  %s1776_s18 = sphi %s1871_s18, %s2476_s18  }
  0x14   : > { %2423 = sst [smem:[#allocation18_spill]] %s1812_s27  ;;  %s37_s8 = sadd.s32 1, %s1824_s30 }
  0x15   : > { %2424 = sst [smem:[#allocation19_spill]] %s1816_s28  ;;  %p35_p0 = scmp.ge.s32.totalorder %s34_s7, 2 }
  0x16   : > { %p2404_p1 = scmp.eq.s32.totalorder %s1828_s6, 0  ;;  %s72_s9 = sadd.s32 1, %s1796_s23 }
  0x17   : > { %p79_p2 = scmp.ne.s32.totalorder %s1796_s23, %s1792_s22  ;;  %s2490_s7 = smov (%p35_p0, %s34_s7), 0 }
  0x18   : > { %2425 = sst [smem:[#allocation20_spill]] %s2490_s7  ;;  %s2492_s8 = smov (!%p35_p0, %s37_s8), %s1824_s30 }
  0x19   : > { %s42_s10 = ssub.s32 %s1820_s29, %s2490_s7  ;;  %p1954_p3 = por %p79_p2, %p2404_p1 }
  0x1a   : > { %p39_p4 = scmp.ge.s32.totalorder %s2492_s8, 2  ;;  %p70_p5 = scmp.eq.s32.totalorder %s42_s10, 0 }
  0x1b   : > { %p2403_p9 = scmp.lt.s32.totalorder %s1828_s6, 4  ;;  %s242_s16 = sand.u32 1, %s1828_s6  }
  0x1c   : > { %s2494_s8 = smov (%p39_p4, %s2492_s8), 0  ;;  %s244_s17 = sand.u32 1, %s1796_s23  }
  0x1d   : > { %2427 = sst [smem:[#allocation21_spill]] %s2494_s8  ;;  %s1967_s13 = ssub.s32 %s1824_s30, %s2494_s8 }
  0x1e   : > { %s1963_s12 = scalar_select %p70_p5, %s1796_s23, %s72_s9  }
  0x1f   : > { %s43_s14 = sor.u32 %s42_s10, %s1967_s13  ;;  %s1151_s7 = sshll.u32 %s244_s17, 6 }
  0x20   : > { %2428 = sst [smem:[#allocation22_spill]] %s1963_s12  ;;  %p1971_p8 = scmp.eq.s32.totalorder %s43_s14, 0 }
  0x21   : > { %s1212_s5 = sshll.u32 %s1820_s29, 10  ;;  %s2430_s1 = sld [smem:[#allocation25_spill]] }
  0x22   : > { %s2429_s15 = scalar_select %p1971_p8, 1, 0 }
  0x23   : > { %s246_s10 = scalar_lea.vmem [#allocation6], %s1151_s7  ;;  %p1988_p10 = pnand %p2403_p9, %p1954_p3 }
  0x24   : > { %s253_s8 = sshll.u32 %s246_s10, 4  ;;  %s1994_s17 = scalar_lea.sflag [#allocation7], %s242_s16  ;;  %s1992_s8 = int_to_ptr.vmem [resolvable:$true] %s253_s8 }
  0x25   : > { %p1554_p12 = pneg %p1988_p10 }
  0x27   : > { %s1982_s9 = scalar_lea.hbm %s2430_s1, %s1212_s5  ;;  %s1557_s7 = scalar_lea.hbm %s2430_s1, 2048 }
  0x28   : > { %s1552_s4 = scalar_lea.hbm %s1982_s9, 1024  ;;  %p1558_p2 = scmp.lt.u32.totalorder %s1982_s9, %s2430_s1 }
  0x29   : > { %p1553_p11 = scmp.ne.s32.totalorder %s1982_s9, %s1552_s4  ;;  %p1559_p3 = scmp.lt.u32.totalorder %s1557_s7, %s1552_s4 }
  0x2a   : > { %p1561_p5 = scmp.lt.u32.totalorder %s1552_s4, %s1982_s9 }
  0x2b   : > { %p1555_p13 = pnand %p1554_p12, %p1553_p11  ;;  %p1560_p4 = por %p1559_p3, %p1558_p2 }
  0x2d   : > { %p1556_p0 = pneg %p1555_p13  ;;  %p1562_p7 = por %p1561_p5, %p1560_p4 }
  0x2f   : > { %p1563_p9 = pnand %p1562_p7, %p1556_p0 }
  0x31   : > { %1566 = shalt.err (!%p1563_p9)
}
  0x32   : > { %s1567_s16 = scalar_lea.vmem %s1992_s8, 1024  ;;  %s1830_s5 = smov [#allocation6]  }
  0x33   : > { %p1568_p11 = scmp.ne.s32.totalorder %s1992_s8, %s1567_s16  ;;  %s1572_s28 = sshll.u32 %s1830_s5, 4  ;;  %s1573_s28 = int_to_ptr.vmem [resolvable:$false] %s1572_s28 }
  0x34   : > { %s1574_s11 = scalar_lea.vmem %s1573_s28, 2048  ;;  %p1575_p6 = scmp.lt.s32.totalorder %s1992_s8, %s1573_s28 }
  0x35   : > { %p1570_p13 = pnand %p1568_p11, %p1554_p12  ;;  %p1576_p2 = scmp.lt.s32.totalorder %s1574_s11, %s1567_s16 }
  0x37   : > { %p1571_p1 = pneg %p1570_p13  ;;  %p1577_p3 = por %p1576_p2, %p1575_p6 }
  0x39   : > { %p1578_p4 = pnand %p1577_p3, %p1571_p1 }
  0x3b   : > { %1581 = shalt.err (!%p1578_p4)
}
  0x3c   : > { %s2405_s4 = smov 64   ;;  %s2407_s7 = smov 4  }
  0x3d   : > { %1381 = dma.hbm_to_vmem [thread:$0]  (!%p1988_p10), %s1982_s9, 1024, %s1992_s8, %s1994_s17, %s2405_s4, %s2405_s4, %s2407_s7  }
  0x3e   : > { %s2026_s10 = sadd.s32 4294967295, %s1828_s6   ;;  %p1144_p1 = scmp.ge.s32.totalorder %s1828_s6, 1 }
  0x3f   : > { %p2410_p6 = scmp.eq.s32.totalorder %s2026_s10, 0  ;;  %p190_p9 = scmp.lt.s32.totalorder %s1828_s6, 5 }
  0x40   : > { %p2432_p12 = scmp.ne.s32.totalorder %s1792_s22, %s1788_s21  ;;  %s1833_s8 = smov [#allocation9]  }
  0x41   : > { %p2041_p5 = pnand %p1144_p1, %p190_p9  ;;  %s202_s9 = sshll.u32 %s1833_s8, 4  ;;  %s203_s9 = int_to_ptr.vmem [resolvable:$true] %s202_s9 }
  0x42   : > { %p2037_p0 = por %p2432_p12, %p2410_p6  ;;  %s46_s21 = sadd.s32 1, %s1808_s26 }
  0x43   : > { %s2435_s14 = scalar_select %p2041_p5, 1, 0 }
  0x44   : > { %s2433_s16 = scalar_select %p2037_p0, 1, 0 }
  0x45   : > { %p1371_p10 = pneg %p2041_p5  ;;  %s2437_s3 = sld [smem:[#allocation26_spill]] }
  0x46   : > { %2434 = sst [smem:[#allocation23_spill]] %s2433_s16 }
  0x47   : > { %p2049_p11 = pnand %p1371_p10, %p2410_p6 }
  0x49   : > { %p1584_p3 = pneg %p2049_p11 }
  0x4b   : > { %s1582_s4 = scalar_lea.hbm %s2437_s3, 2048 }
  0x4c   : > { %p1583_p2 = scmp.ne.s32.totalorder %s2437_s3, %s1582_s4  ;;  %p1589_p9 = scmp.lt.u32.totalorder %s1582_s4, %s2437_s3 }
  0x4e   : > { %p1585_p4 = pnand %p1584_p3, %p1583_p2 }
  0x50   : > { %p1586_p1 = pneg %p1585_p4 }
  0x52   : > { %p1591_p12 = pnand %p1589_p9, %p1586_p1 }
  0x54   : > { %1594 = shalt.err (!%p1591_p12)
}
  0x55   : > { %s1595_s23 = scalar_lea.vmem %s203_s9, 2048  ;;  %p1603_p13 = scmp.lt.s32.totalorder %s203_s9, %s203_s9 }
  0x56   : > { %p1596_p10 = scmp.ne.s32.totalorder %s203_s9, %s1595_s23  ;;  %p1604_p0 = scmp.lt.s32.totalorder %s1595_s23, %s1595_s23 }
  0x58   : > { %p1598_p7 = pnand %p1596_p10, %p1584_p3  ;;  %p1605_p5 = por %p1604_p0, %p1603_p13 }
  0x5a   : > { %p1599_p6 = pneg %p1598_p7 }
  0x5c   : > { %p1606_p8 = pnand %p1605_p5, %p1599_p6 }
  0x5e   : > { %1609 = shalt.err (!%p1606_p8)
}
  0x5f   : > { %s2438_s1 = smov 4   ;;  %s2439_s7 = smov 64  }
  0x60   : > { %1374 = dma.hbm_to_vmem [thread:$0]  (!%p2049_p11), %s2437_s3, 2048, %s203_s9, [#allocation10], %s2439_s7, %s2439_s7, %s2438_s1  }
  0x61   : > { %p2440_p8 = scmp.ne.s32.totalorder %s2429_s15, 0  ;;  %p2441_p6 = scmp.ne.s32.totalorder %s1808_s26, %s1804_s25 }
  0x62   : > { %p2442_p7 = scmp.eq.s32.totalorder %s1828_s6, 0  ;;  %p59_p5 = scmp.ne.s32.totalorder %s1804_s25, %s1800_s24 }
  0x63   : > { %s2078_s23 = scalar_select %p2440_p8, %s1808_s26, %s46_s21  }
  0x64   : > { %p55_p0 = por %p2442_p7, %p2441_p6  ;;  %s219_s12 = sand.u32 1, %s1808_s26  }
  0x65   : > { %s1211_s4 = sshll.u32 %s1824_s30, 5  ;;  %p2443_p13 = scmp.eq.s32.totalorder %s2026_s10, 0 }
  0x66   : > { %s1147_s8 = sshll.u32 %s219_s12, 6  ;;  %s229_s28 = sadd.s32 %s1820_s29, %s1211_s4 }
  0x67   : > { %p2091_p2 = por %p2443_p13, %p59_p5  ;;  %s1150_s11 = sshll.u32 %s229_s28, 6 }
  0x68   : > { %s2445_s0 = sld [smem:[#allocation24_spill]]  ;;  %s223_s24 = scalar_lea.vmem [#allocation3], %s1147_s8 }
  0x69   : > { %s232_s9 = sshll.u32 %s223_s24, 4  ;;  %p2446_p11 = scmp.lt.s32.totalorder %s1828_s6, 4  ;;  %s2101_s9 = int_to_ptr.vmem [resolvable:$true] %s232_s9 }
  0x6a   : > { %s2109_s4 = scalar_lea.sflag [#allocation4], %s219_s12 }
  0x6b   : > { %p2105_p3 = pnand %p2446_p11, %p55_p0 }
  0x6d   : > { %p1612_p1 = pneg %p2105_p3 }
  0x6e   : > { %s2099_s15 = scalar_lea.hbm %s2445_s0, %s1150_s11  ;;  %s1615_s28 = scalar_lea.hbm %s2445_s0, 4096 }
  0x6f   : > { %s1610_s27 = scalar_lea.hbm %s2099_s15, 1024  ;;  %p1616_p10 = scmp.lt.u32.totalorder %s2099_s15, %s2445_s0 }
  0x70   : > { %p1611_p4 = scmp.ne.s32.totalorder %s2099_s15, %s1610_s27  ;;  %p1617_p8 = scmp.lt.u32.totalorder %s1615_s28, %s1610_s27 }
  0x71   : > { %p1619_p7 = scmp.lt.u32.totalorder %s1610_s27, %s2099_s15 }
  0x72   : > { %p1613_p9 = pnand %p1612_p1, %p1611_p4  ;;  %p1618_p6 = por %p1617_p8, %p1616_p10 }
  0x74   : > { %p1614_p12 = pneg %p1613_p9  ;;  %p1620_p0 = por %p1619_p7, %p1618_p6 }
  0x76   : > { %p1621_p5 = pnand %p1620_p0, %p1614_p12 }
  0x78   : > { %1624 = shalt.err (!%p1621_p5)
}
  0x79   : > { %s1625_s12 = scalar_lea.vmem %s2101_s9, 1024  ;;  %s1834_s16 = smov [#allocation3]  }
  0x7a   : > { %p1626_p13 = scmp.ne.s32.totalorder %s2101_s9, %s1625_s12  ;;  %s1630_s8 = sshll.u32 %s1834_s16, 4  ;;  %s1631_s8 = int_to_ptr.vmem [resolvable:$false] %s1630_s8 }
  0x7b   : > { %s1632_s11 = scalar_lea.vmem %s1631_s8, 2048  ;;  %p1633_p9 = scmp.lt.s32.totalorder %s2101_s9, %s1631_s8 }
  0x7c   : > { %p1628_p11 = pnand %p1626_p13, %p1612_p1  ;;  %p1634_p10 = scmp.lt.s32.totalorder %s1632_s11, %s1625_s12 }
  0x7e   : > { %p1629_p4 = pneg %p1628_p11  ;;  %p1635_p8 = por %p1634_p10, %p1633_p9 }
  0x80   : > { %p1636_p6 = pnand %p1635_p8, %p1629_p4 }
  0x82   : > { %1639 = shalt.err (!%p1636_p6)
}
  0x83   : > { %s1835_s27 = smov 128   ;;  %s1143_s21 = sadd.s32 4294967294, %s1828_s6  }
  0x84   : > { %1378 = dma.hbm_to_vmem [thread:$0]  (!%p2105_p3), %s2099_s15, 1024, %s2101_s9, %s2109_s4, %s1835_s27, %s2439_s7, %s2438_s1  }
  0x85   : > { %s98_s28 = sadd.s32 1, %s1784_s20  ;;  %p2448_p1 = scmp.eq.s32.totalorder %s1967_s13, 0 }
  0x86   : > { %p105_p12 = scmp.ne.s32.totalorder %s1784_s20, %s1780_s19  ;;  %p111_p7 = scmp.ne.s32.totalorder %s1780_s19, %s1776_s18 }
  0x87   : > { %s2144_s24 = scalar_select %p2448_p1, %s1784_s20, %s98_s28  }
  0x88   : > { %p183_p0 = scmp.eq.s32.totalorder %s1143_s21, 3  ;;  %s265_s12 = sand.u32 1, %s1784_s20  }
  0x89   : > { %p2449_p5 = scmp.eq.s32.totalorder %s1828_s6, 0  ;;  %p2450_p11 = scmp.eq.s32.totalorder %s2026_s10, 0 }
  0x8a   : > { %p2452_p9 = scmp.eq.s32.totalorder %s2026_s10, 3  ;;  %p2165_p3 = por %p183_p0, %p111_p7 }
  0x8b   : > { %p107_p13 = por %p105_p12, %p2449_p5  ;;  %p2155_p4 = por %p111_p7, %p2450_p11 }
  0x8c   : > { %p2161_p10 = por %p2452_p9, %p105_p12  ;;  %s1154_s9 = sshll.u32 %s265_s12, 6 }
  0x8d   : > { %s2451_s16 = scalar_select %p2155_p4, 1, 0 }
  0x8e   : > { %s2453_s15 = scalar_select %p2161_p10, 1, 0 }
  0x8f   : > { %s2454_s13 = scalar_select %p2165_p3, 1, 0 }
  0x90   : > { %s1213_s4 = sshll.u32 %s1824_s30, 10  ;;  %s267_s21 = scalar_lea.vmem [#allocation8], %s1154_s9 }
  0x91   : > { %s2173_s27 = scalar_lea.hbm %s2396_s2, %s1213_s4  ;;  %s274_s28 = sshll.u32 %s267_s21, 4  ;;  %s2181_s28 = int_to_ptr.vmem [resolvable:$true] %s274_s28 }
  0x92   : > { %p2455_p8 = scmp.lt.s32.totalorder %s1828_s6, 4  ;;  %s1640_s12 = scalar_lea.hbm %s2173_s27, 1024 }
  0x93   : > { %p1641_p1 = scmp.ne.s32.totalorder %s2173_s27, %s1640_s12  ;;  %s1645_s8 = scalar_lea.hbm %s2396_s2, 2048 }
  0x94   : > { %p2177_p6 = pnand %p2455_p8, %p107_p13  ;;  %p1646_p5 = scmp.lt.u32.totalorder %s2173_s27, %s2396_s2 }
  0x95   : > { %p1647_p13 = scmp.lt.u32.totalorder %s1645_s8, %s1640_s12  ;;  %p1649_p9 = scmp.lt.u32.totalorder %s1640_s12, %s2173_s27 }
  0x96   : > { %p1642_p12 = pneg %p2177_p6 }
  0x97   : > { %p1648_p11 = por %p1647_p13, %p1646_p5 }
  0x98   : > { %p1643_p7 = pnand %p1642_p12, %p1641_p1 }
  0x99   : > { %p1650_p8 = por %p1649_p9, %p1648_p11 }
  0x9a   : > { %p1644_p0 = pneg %p1643_p7 }
  0x9c   : > { %p1651_p3 = pnand %p1650_p8, %p1644_p0 }
  0x9e   : > { %1654 = shalt.err (!%p1651_p3)
}
  0x9f   : > { %s1655_s3 = scalar_lea.vmem %s2181_s28, 1024  ;;  %s1836_s4 = smov [#allocation8]  }
  0xa0   : > { %p1656_p1 = scmp.ne.s32.totalorder %s2181_s28, %s1655_s3  ;;  %s1660_s9 = sshll.u32 %s1836_s4, 4  ;;  %s1661_s9 = int_to_ptr.vmem [resolvable:$false] %s1660_s9 }
  0xa1   : > { %s1662_s11 = scalar_lea.vmem %s1661_s9, 2048  ;;  %p1663_p4 = scmp.lt.s32.totalorder %s2181_s28, %s1661_s9 }
  0xa2   : > { %p1658_p7 = pnand %p1656_p1, %p1642_p12  ;;  %p1664_p5 = scmp.lt.s32.totalorder %s1662_s11, %s1655_s3 }
  0xa4   : > { %p1659_p10 = pneg %p1658_p7  ;;  %p1665_p13 = por %p1664_p5, %p1663_p4 }
  0xa6   : > { %p1666_p11 = pnand %p1665_p13, %p1659_p10 }
  0xa8   : > { %1669 = shalt.err (!%p1666_p11)
}
  0xa9   : > { %1384 = dma.hbm_to_vmem [thread:$0]  (!%p2177_p6), %s2173_s27, 1024, %s2181_s28, %s1994_s17, %s2439_s7, %s2439_s7, %s2438_s1  }
  0xaa   : > { %p2457_p3 = scmp.ne.s32.totalorder %s2435_s14, 0 }
  0xab   : > { %s288_s12 = sand.u32 (!%p2457_p3), 1, %s1804_s25  }
  0xac   : > { %286 = sbr.rel (%p2457_p3) target bundleno = 746 (0x2ea), region = 40  ;;  %s1158_s8 = sshll.u32 (!%p2457_p3), %s288_s12, 6 }
  0xad   : > { %s289_s3 = scalar_lea.sflag (!%p2457_p3), [#allocation4], %s288_s12  ;;  %s2215_s21 = scalar_lea.vmem (!%p2457_p3), [#allocation3], %s1158_s8 }
  0xb3   : > { %1755 = dma.done.wait (%p2091_p2), %s289_s3, 1024  }
  0xb4   : > { %1757 = vsyncadd (%p2091_p2), %s289_s3, 4294966272  ;;  %s2458_s0 = sld [smem:[#allocation23_spill]]  ;;  %s297_s4 = sand.u32 1, %s2026_s10  }
  0xb5   : > { %s299_s17 = sand.u32 1, %s1792_s22   ;;  %s298_s14 = scalar_lea.sflag [#allocation7], %s297_s4 }
  0xb6   : > { %s1159_s1 = sshll.u32 %s299_s17, 6 }
  0xb7   : > { %s2223_s7 = scalar_lea.vmem [#allocation6], %s1159_s1 }
  0xba   : > { %p2459_p4 = scmp.ne.s32.totalorder %s2458_s0, 0 }
  0xbc   : > { %1759 = dma.done.wait (%p2459_p4), %s298_s14, 1024  }
  0xbd   : > { %1761 = vsyncadd (%p2459_p4), %s298_s14, 4294966272  ;;  %s2230_s27 = sand.u32 1, %s1780_s19   ;;  %p2460_p2 = scmp.ne.s32.totalorder %s2451_s16, 0 }
  0xbe   : > { %s1160_s5 = sshll.u32 %s2230_s27, 6 }
  0xbf   : > { %s2233_s28 = scalar_lea.vmem [#allocation8], %s1160_s5 }
  0xc0   : > { %1763 = dma.done.wait (%p2460_p2), %s298_s14, 1024  }
  0xc1   : > { %1765 = vsyncadd (%p2460_p2), %s298_s14, 4294966272  ;;  %p2461_p10 = scmp.eq.s32.totalorder %s2026_s10, 0 }
  0xc3   : > { %1767 = dma.done.wait (%p2461_p10), [#allocation10], 2048   ;;  %p2462_p6 = pmov %p2461_p10 }
  0xc4   : > { %s1162_s9 = sshll.u32 %s2230_s27, 7  ;;  %s2463_s12 = sld [smem:[#allocation18_spill]] }
  0xc5   : > { %1769 = vsyncadd (%p2462_p6), [#allocation10], 4294965248  ;;  %s2244_s11 = scalar_lea.vmem [#allocation11], %s1162_s9 }
  0xca   : > { %p1163_p12 = scmp.ne.s32.totalorder %s2463_s12, 0 }
  0xcb   : > { %v1837_v0 = vmov (!%p1163_p12), 0.0  }
  0xcc   : > { %359 = sbr.rel (%p1163_p12) target bundleno = 212 (0xd4), region = 60  ;;  %360 = vst [vmem:[#allocation2] sm:$0xff] (!%p1163_p12), %v1837_v0  ;;  %361 = vst [vmem:[#allocation2 + $0x8] sm:$0xff] (!%p1163_p12), %v1837_v0 }
  0xcd   : > { %362 = vst [vmem:[#allocation2 + $0x10] sm:$0xff] (!%p1163_p12), %v1837_v0  ;;  %363 = vst [vmem:[#allocation2 + $0x18] sm:$0xff] (!%p1163_p12), %v1837_v0 }
  0xce   : > { %364 = vst [vmem:[#allocation2 + $0x20] sm:$0xff] (!%p1163_p12), %v1837_v0  ;;  %365 = vst [vmem:[#allocation2 + $0x28] sm:$0xff] (!%p1163_p12), %v1837_v0 }
  0xcf   : > { %366 = vst [vmem:[#allocation2 + $0x30] sm:$0xff] (!%p1163_p12), %v1837_v0  ;;  %367 = vst [vmem:[#allocation2 + $0x38] sm:$0xff] (!%p1163_p12), %v1837_v0 }
  0xd0   : > { %368 = vst [vmem:[#allocation2 + $0x40] sm:$0xff] (!%p1163_p12), %v1837_v0  ;;  %369 = vst [vmem:[#allocation2 + $0x48] sm:$0xff] (!%p1163_p12), %v1837_v0 }
  0xd1   : > { %370 = vst [vmem:[#allocation2 + $0x50] sm:$0xff] (!%p1163_p12), %v1837_v0  ;;  %371 = vst [vmem:[#allocation2 + $0x58] sm:$0xff] (!%p1163_p12), %v1837_v0 }
  0xd2   : > { %372 = vst [vmem:[#allocation2 + $0x60] sm:$0xff] (!%p1163_p12), %v1837_v0  ;;  %373 = vst [vmem:[#allocation2 + $0x68] sm:$0xff] (!%p1163_p12), %v1837_v0 }
  0xd3   : > { %374 = vst [vmem:[#allocation2 + $0x70] sm:$0xff] %v1837_v0  ;;  %375 = vst [vmem:[#allocation2 + $0x78] sm:$0xff] %v1837_v0 }
  0xd4 PF: > { %v1512_v1 = vld [vmem:[%s2223_s7] sm:$0xff]   ;;  %v1513_v2 = vld [vmem:[%s2223_s7 + $0x8] sm:$0xff]   ;;  %v1514_v3 = vld [vmem:[%s2223_s7 + $0x10] sm:$0xff]   ;;  %s2464_s10 = sld [smem:[#allocation18_spill]] }
  0xd5   : > { %1295 = vmatprep.subr.bf16.mxu0 %v1512_v1  ;;  %1327 = vmatprep.subr.bf16.mxu1 %v1512_v1  ;;  %v1515_v4 = vld [vmem:[%s2223_s7 + $0x18] sm:$0xff]   ;;  %v1520_v5 = vld [vmem:[%s2215_s21] sm:$0xff]   ;;  %v1517_v8 = vld [vmem:[%s2223_s7 + $0x28] sm:$0xff]  }
  0xd6   : > { %1296 = vmatpush3.bf16.msra.mxu0 %v1512_v1  ;;  %1335 = vmatpush3.bf16.msra.mxu1 %v1512_v1  ;;  %v1521_v6 = vld [vmem:[%s2215_s21 + $0x20] sm:$0xff]   ;;  %v1518_v9 = vld [vmem:[%s2223_s7 + $0x30] sm:$0xff]   ;;  %v1519_v10 = vld [vmem:[%s2223_s7 + $0x38] sm:$0xff]  }
  0xd7   : > { %1297 = vmatprep.subr.bf16.mxu0 %v1513_v2  ;;  %1328 = vmatprep.subr.bf16.mxu1 %v1513_v2  ;;  %v1516_v7 = vld [vmem:[%s2223_s7 + $0x20] sm:$0xff]   ;;  %v1522_v11 = vld [vmem:[%s2215_s21 + $0x8] sm:$0xff]   ;;  %v1524_v13 = vld [vmem:[%s2215_s21 + $0x10] sm:$0xff]  }
  0xd8   : > { %1311 = vmatprep.mubr.bf16.mxu0 %v1520_v5  ;;  %1319 = vmatprep.mubr.bf16.mxu1 %v1521_v6  ;;  %v1523_v12 = vld [vmem:[%s2215_s21 + $0x28] sm:$0xff]   ;;  %v1525_v14 = vld [vmem:[%s2215_s21 + $0x30] sm:$0xff]   ;;  %v1526_v15 = vld [vmem:[%s2215_s21 + $0x18] sm:$0xff]  }
  0xd9   : > { %v1527_v16 = vld [vmem:[%s2215_s21 + $0x38] sm:$0xff]   ;;  %v378_v17 = vld [vmem:[#allocation2 + $0x10] sm:$0xff]  ;;  %v376_v19 = vld [vmem:[#allocation2] sm:$0xff] }
  0xda   : > { %1298 = vmatpush3.bf16.msra.mxu0 %v1513_v2  ;;  %1336 = vmatpush3.bf16.msra.mxu1 %v1513_v2  ;;  %v386_v18 = vld [vmem:[#allocation2 + $0x50] sm:$0xff]  ;;  %v384_v20 = vld [vmem:[#allocation2 + $0x40] sm:$0xff]  ;;  %v379_v23 = vld [vmem:[#allocation2 + $0x18] sm:$0xff]  ;;  %p1180_p0 = scmp.ne.s32.totalorder %s2464_s10, 1 }
  0xdb   : > { %1299 = vmatprep.subr.bf16.mxu0 %v1514_v3  ;;  %1329 = vmatprep.subr.bf16.mxu1 %v1514_v3  ;;  %v387_v24 = vld [vmem:[#allocation2 + $0x58] sm:$0xff]  ;;  %v377_v29 = vld [vmem:[#allocation2 + $0x8] sm:$0xff]  ;;  %v382_v41 = vld [vmem:[#allocation2 + $0x30] sm:$0xff]  ;;  %s2465_s3 = sld [smem:[#allocation27_spill]] (!%p1180_p0) }
  0xdc   : > { %v385_v30 = vld [vmem:[#allocation2 + $0x48] sm:$0xff]  ;;  %v390_v42 = vld [vmem:[#allocation2 + $0x70] sm:$0xff]  ;;  %v380_v43 = vld [vmem:[#allocation2 + $0x20] sm:$0xff] }
  0xdd   : > { %v388_v44 = vld [vmem:[#allocation2 + $0x60] sm:$0xff]  ;;  %v383_v47 = vld [vmem:[#allocation2 + $0x38] sm:$0xff]  ;;  %v381_v53 = vld [vmem:[#allocation2 + $0x28] sm:$0xff] }
  0xde   : > { %1300 = vmatpush3.bf16.msra.mxu0 %v1514_v3  ;;  %1337 = vmatpush3.bf16.msra.mxu1 %v1514_v3  ;;  %v391_v48 = vld [vmem:[#allocation2 + $0x78] sm:$0xff]  ;;  %v389_v54 = vld [vmem:[#allocation2 + $0x68] sm:$0xff]  ;;  %v1528_v1 = vld [vmem:[#allocation9 + $0x40] sm:$0xff] (!%p1180_p0)  }
  0xdf   : > { %1301 = vmatprep.subr.bf16.mxu0 %v1515_v4  ;;  %1330 = vmatprep.subr.bf16.mxu1 %v1515_v4  ;;  %v1529_v2 = vld [vmem:[#allocation9] sm:$0xff] (!%p1180_p0)   ;;  %v1530_v3 = vld [vmem:[#allocation9 + $0x48] sm:$0xff] (!%p1180_p0)   ;;  %v1532_v5 = vld [vmem:[#allocation9 + $0x50] sm:$0xff] (!%p1180_p0)  }
  0xe0   : > { %v1533_v6 = vld [vmem:[#allocation9 + $0x10] sm:$0xff] (!%p1180_p0)  }
  0xe2   : > { %1302 = vmatpush3.bf16.msra.mxu0 %v1515_v4  ;;  %1338 = vmatpush3.bf16.msra.mxu1 %v1515_v4  ;;  %v1531_v4 = vld [vmem:[#allocation9 + $0x8] sm:$0xff] (!%p1180_p0)  }
  0xe3   : > { %1303 = vmatprep.subr.bf16.mxu0 %v1516_v7  ;;  %1331 = vmatprep.subr.bf16.mxu1 %v1516_v7 }
  0xe6   : > { %1304 = vmatpush3.bf16.msra.mxu0 %v1516_v7  ;;  %1339 = vmatpush3.bf16.msra.mxu1 %v1516_v7  ;;  %v1534_v7 = vld [vmem:[#allocation9 + $0x58] sm:$0xff] (!%p1180_p0)  }
  0xe7   : > { %1305 = vmatprep.subr.bf16.mxu0 %v1517_v8  ;;  %1332 = vmatprep.subr.bf16.mxu1 %v1517_v8 }
  0xea   : > { %1306 = vmatpush3.bf16.msra.mxu0 %v1517_v8  ;;  %1340 = vmatpush3.bf16.msra.mxu1 %v1517_v8  ;;  %v1535_v8 = vld [vmem:[#allocation9 + $0x18] sm:$0xff] (!%p1180_p0)  }
  0xeb   : > { %1307 = vmatprep.subr.bf16.mxu0 %v1518_v9  ;;  %1333 = vmatprep.subr.bf16.mxu1 %v1518_v9 }
  0xee   : > { %1308 = vmatpush3.bf16.msra.mxu0 %v1518_v9  ;;  %1341 = vmatpush3.bf16.msra.mxu1 %v1518_v9  ;;  %v1536_v9 = vld [vmem:[#allocation9 + $0x60] sm:$0xff] (!%p1180_p0)  }
  0xef   : > { %1309 = vmatprep.subr.bf16.mxu0 %v1519_v10  ;;  %1334 = vmatprep.subr.bf16.mxu1 %v1519_v10 }
  0xf2   : > { %1310 = vmatpush3.bf16.msra.mxu0 %v1519_v10  ;;  %1342 = vmatpush3.bf16.msra.mxu1 %v1519_v10  ;;  %v1537_v10 = vld [vmem:[#allocation9 + $0x20] sm:$0xff] (!%p1180_p0)  }
  0xf3   : > { %1231 = vmatprep.subr.bf16.mxu0 (!%p1180_p0), %v1528_v1  ;;  %1343 = vmatprep.subr.bf16.mxu1 (!%p1180_p0), %v1528_v1 }
  0xf5   : > { %1312 = vmatmul.mubr.bf16.vlgmr.msra.gmra.mrb[0].mxu0 %v1522_v11  ;;  %1320 = vmatmul.mubr.bf16.vlgmr.msra.gmra.mrb[0].mxu1 %v1523_v12  ;;  %v1538_v11 = vld [vmem:[#allocation9 + $0x68] sm:$0xff] (!%p1180_p0)  }
  0xf6   : > { %1315 = vmatprep.mubr.bf16.mxu0 %v1524_v13  ;;  %1323 = vmatprep.mubr.bf16.mxu1 %v1525_v14 }
  0xf7   : > { %1232 = vmatpush3.bf16.msra.mxu0 (!%p1180_p0), %v1529_v2  ;;  %1351 = vmatpush3.bf16.msra.mxu1 (!%p1180_p0), %v1529_v2 }
  0xf8   : > { %1233 = vmatprep.subr.bf16.mxu0 (!%p1180_p0), %v1530_v3  ;;  %1344 = vmatprep.subr.bf16.mxu1 (!%p1180_p0), %v1530_v3 }
  0xfb   : > { %1234 = vmatpush3.bf16.msra.mxu0 (!%p1180_p0), %v1531_v4  ;;  %1352 = vmatpush3.bf16.msra.mxu1 (!%p1180_p0), %v1531_v4 }
  0xfc   : > { %1235 = vmatprep.subr.bf16.mxu0 (!%p1180_p0), %v1532_v5  ;;  %1345 = vmatprep.subr.bf16.mxu1 (!%p1180_p0), %v1532_v5 }
  0xfd   : > { %1316 = vmatmul.mubr.bf16.gmra.mrb[4].mxu0 %v1526_v15  ;;  %1324 = vmatmul.mubr.bf16.gmra.mrb[4].mxu1 %v1527_v16 }
  0xff   : > { %1236 = vmatpush3.bf16.msra.mxu0 (!%p1180_p0), %v1533_v6  ;;  %1353 = vmatpush3.bf16.msra.mxu1 (!%p1180_p0), %v1533_v6 }
 0x100   : > { %1237 = vmatprep.subr.bf16.mxu0 (!%p1180_p0), %v1534_v7  ;;  %1346 = vmatprep.subr.bf16.mxu1 (!%p1180_p0), %v1534_v7 }
 0x103   : > { %1238 = vmatpush3.bf16.msra.mxu0 (!%p1180_p0), %v1535_v8  ;;  %1354 = vmatpush3.bf16.msra.mxu1 (!%p1180_p0), %v1535_v8 }
 0x104   : > { %1239 = vmatprep.subr.bf16.mxu0 (!%p1180_p0), %v1536_v9  ;;  %1347 = vmatprep.subr.bf16.mxu1 (!%p1180_p0), %v1536_v9 }
 0x107   : > { %1240 = vmatpush3.bf16.msra.mxu0 (!%p1180_p0), %v1537_v10  ;;  %1355 = vmatpush3.bf16.msra.mxu1 (!%p1180_p0), %v1537_v10 }
 0x108   : > { %1241 = vmatprep.subr.bf16.mxu0 (!%p1180_p0), %v1538_v11  ;;  %1348 = vmatprep.subr.bf16.mxu1 (!%p1180_p0), %v1538_v11 }
 0x1c8   : > { %v1313_v21 = vpop.f32.mrb[0].mxu0  ;;  %v1321_v22 = vpop.f32.mrb[0].mxu1 }
 0x1c9   : > { %v619_v25 = vadd.f32 %v1313_v21, %v378_v17  ;;  %v627_v26 = vadd.f32 %v1321_v22, %v386_v18  ;;  %v554_v27 = vpop.f32.mrb[1].mxu0  ;;  %v586_v28 = vpop.f32.mrb[1].mxu1  ;;  %v1539_v18 = vld [vmem:[#allocation9 + $0x28] sm:$0xff] (!%p1180_p0)   ;;  %v1542_v21 = vld [vmem:[#allocation9 + $0x78] sm:$0xff] (!%p1180_p0)  }
 0x1ca   : > { %v617_v31 = vadd.f32 %v554_v27, %v376_v19  ;;  %v625_v32 = vadd.f32 %v586_v28, %v384_v20  ;;  %v1314_v33 = vpop.f32.mrb[2].mxu0  ;;  %v1322_v34 = vpop.f32.mrb[2].mxu1  ;;  %v1540_v19 = vld [vmem:[#allocation9 + $0x70] sm:$0xff] (!%p1180_p0)   ;;  %1242 = vmatpush3.bf16.msra.mxu0 (!%p1180_p0), %v1539_v18  ;;  %1356 = vmatpush3.bf16.msra.mxu1 (!%p1180_p0), %v1539_v18  ;;  %v1543_v22 = vld [vmem:[#allocation9 + $0x38] sm:$0xff] (!%p1180_p0)   ;;  %v1544_v27 = vld [vmem:[%s2233_s28] sm:$0xff] (!%p1180_p0)  }
 0x1cb   : > { %635 = vst [vmem:[#allocation2 + $0x10] sm:$0xff] %v619_v25  ;;  %643 = vst [vmem:[#allocation2 + $0x50] sm:$0xff] %v627_v26  ;;  %v620_v35 = vadd.f32 %v1314_v33, %v379_v23  ;;  %v628_v36 = vadd.f32 %v1322_v34, %v387_v24  ;;  %v557_v37 = vpop.f32.mrb[3].mxu0  ;;  %v589_v38 = vpop.f32.mrb[3].mxu1  ;;  %v1541_v20 = vld [vmem:[#allocation9 + $0x30] sm:$0xff] (!%p1180_p0)   ;;  %1243 = vmatprep.subr.bf16.mxu0 (!%p1180_p0), %v1540_v19  ;;  %1349 = vmatprep.subr.bf16.mxu1 (!%p1180_p0), %v1540_v19  ;;  %v1545_v28 = vld [vmem:[%s2233_s28 + $0x20] sm:$0xff] (!%p1180_p0)  }
 0x1cc   : > { %633 = vst [vmem:[#allocation2] sm:$0xff] %v617_v31  ;;  %641 = vst [vmem:[#allocation2 + $0x40] sm:$0xff] %v625_v32  ;;  %v618_v39 = vadd.f32 %v557_v37, %v377_v29  ;;  %v626_v40 = vadd.f32 %v589_v38, %v385_v30 }
 0x1cd   : > { %636 = vst [vmem:[#allocation2 + $0x18] sm:$0xff] %v620_v35  ;;  %644 = vst [vmem:[#allocation2 + $0x58] sm:$0xff] %v628_v36  ;;  %v1546_v35 = vld [vmem:[%s2233_s28 + $0x8] sm:$0xff] (!%p1180_p0)  }
 0x1ce   : > { %634 = vst [vmem:[#allocation2 + $0x8] sm:$0xff] %v618_v39  ;;  %642 = vst [vmem:[#allocation2 + $0x48] sm:$0xff] %v626_v40  ;;  %1244 = vmatpush3.bf16.msra.mxu0 (!%p1180_p0), %v1541_v20  ;;  %1357 = vmatpush3.bf16.msra.mxu1 (!%p1180_p0), %v1541_v20  ;;  %v1547_v36 = vld [vmem:[%s2233_s28 + $0x28] sm:$0xff] (!%p1180_p0)  }
 0x1cf   : > { %1245 = vmatprep.subr.bf16.mxu0 (!%p1180_p0), %v1542_v21  ;;  %1350 = vmatprep.subr.bf16.mxu1 (!%p1180_p0), %v1542_v21 }
 0x1d0   : > { %v1317_v45 = vpop.f32.mrb[4].mxu0  ;;  %v1325_v46 = vpop.f32.mrb[4].mxu1  ;;  %652 = sbr.rel (%p1180_p0) target bundleno = 718 (0x2ce), region = 64 }
 0x1d1   : > { %v623_v49 = vadd.f32 %v1317_v45, %v382_v41  ;;  %v631_v50 = vadd.f32 %v1325_v46, %v390_v42  ;;  %v570_v51 = vpop.f32.mrb[5].mxu0  ;;  %v602_v52 = vpop.f32.mrb[5].mxu1 }
 0x1d2   : > { %v621_v55 = vadd.f32 %v570_v51, %v380_v43  ;;  %v629_v56 = vadd.f32 %v602_v52, %v388_v44  ;;  %v1318_v57 = vpop.f32.mrb[6].mxu0  ;;  %v1326_v58 = vpop.f32.mrb[6].mxu1  ;;  %v671_v23 = vld [vmem:[#allocation2 + $0x10] sm:$0xff] (!%p1180_p0)  ;;  %1246 = vmatpush3.bf16.msra.mxu0 (!%p1180_p0), %v1543_v22  ;;  %1358 = vmatpush3.bf16.msra.mxu1 (!%p1180_p0), %v1543_v22  ;;  %v2275_v51 = vld [vmem:[%s2465_s3] ss:$0 sm:$0xff] (!%p1180_p0) }
 0x1d3   : > { %639 = vst [vmem:[#allocation2 + $0x30] sm:$0xff] %v623_v49  ;;  %647 = vst [vmem:[#allocation2 + $0x70] sm:$0xff] %v631_v50  ;;  %v624_v59 = vadd.f32 %v1318_v57, %v383_v47  ;;  %v632_v60 = vadd.f32 %v1326_v58, %v391_v48  ;;  %v573_v61 = vpop.f32.mrb[7].mxu0  ;;  %v605_v62 = vpop.f32.mrb[7].mxu1  ;;  %v669_v12 = vld [vmem:[#allocation2] sm:$0xff] (!%p1180_p0)  ;;  %v679_v25 = vld [vmem:[#allocation2 + $0x50] sm:$0xff] (!%p1180_p0) }
 0x1d4   : > { %637 = vst [vmem:[#allocation2 + $0x20] sm:$0xff] %v621_v55  ;;  %645 = vst [vmem:[#allocation2 + $0x60] sm:$0xff] %v629_v56  ;;  %v622_v63 = vadd.f32 %v573_v61, %v381_v53  ;;  %v630_v0 = vadd.f32 %v605_v62, %v389_v54  ;;  %v677_v14 = vld [vmem:[#allocation2 + $0x40] sm:$0xff] (!%p1180_p0)  ;;  %v672_v24 = vld [vmem:[#allocation2 + $0x18] sm:$0xff] (!%p1180_p0) }
 0x1d5   : > { %640 = vst [vmem:[#allocation2 + $0x38] sm:$0xff] %v624_v59  ;;  %648 = vst [vmem:[#allocation2 + $0x78] sm:$0xff] %v632_v60  ;;  %v670_v13 = vld [vmem:[#allocation2 + $0x8] sm:$0xff] (!%p1180_p0)  ;;  %v680_v26 = vld [vmem:[#allocation2 + $0x58] sm:$0xff] (!%p1180_p0)  ;;  %v686_v29 = vpack.c.bf16 (!%p1180_p0), %v672_v24, %v671_v23 }
 0x1d6   : > { %638 = vst [vmem:[#allocation2 + $0x28] sm:$0xff] %v622_v63  ;;  %646 = vst [vmem:[#allocation2 + $0x68] sm:$0xff] %v630_v0  ;;  %v685_v15 = vpack.c.bf16 (!%p1180_p0), %v670_v13, %v669_v12  ;;  %v678_v16 = vld [vmem:[#allocation2 + $0x48] sm:$0xff] (!%p1180_p0)  ;;  %v690_v30 = vpack.c.bf16 (!%p1180_p0), %v680_v26, %v679_v25  ;;  %v1548_v43 = vld [vmem:[%s2233_s28 + $0x10] sm:$0xff] (!%p1180_p0)  }
 0x1d7   : > { %v689_v17 = vpack.c.bf16 %v678_v16, %v677_v14  ;;  %v1549_v44 = vld [vmem:[%s2233_s28 + $0x30] sm:$0xff]   ;;  %v1550_v47 = vld [vmem:[%s2233_s28 + $0x18] sm:$0xff]  }
 0x1d8   : > { %908 = vmatprep.mubr.bf16.mxu0 %v685_v15  ;;  %v1551_v48 = vld [vmem:[%s2233_s28 + $0x38] sm:$0xff]  }
 0x1d9   : > { %940 = vmatprep.mubr.bf16.mxu1 %v689_v17  ;;  %909 = vmatmul.mubr.bf16.vlgmr.msra.gmra.mrb[0].mxu0 %v1544_v27 }
 0x1da   : > { %941 = vmatmul.mubr.bf16.vlgmr.msra.gmra.mrb[0].mxu1 %v1545_v28  ;;  %916 = vmatprep.mubr.bf16.mxu0 %v686_v29  ;;  %v675_v39 = vld [vmem:[#allocation2 + $0x30] sm:$0xff] }
 0x1db   : > { %948 = vmatprep.mubr.bf16.mxu1 %v690_v30  ;;  %v673_v31 = vld [vmem:[#allocation2 + $0x20] sm:$0xff]  ;;  %v683_v41 = vld [vmem:[#allocation2 + $0x70] sm:$0xff] }
 0x1dc   : > { %v681_v33 = vld [vmem:[#allocation2 + $0x60] sm:$0xff]  ;;  %v676_v40 = vld [vmem:[#allocation2 + $0x38] sm:$0xff] }
 0x1dd   : > { %v674_v32 = vld [vmem:[#allocation2 + $0x28] sm:$0xff]  ;;  %v684_v42 = vld [vmem:[#allocation2 + $0x78] sm:$0xff]  ;;  %v688_v45 = vpack.c.bf16 %v676_v40, %v675_v39 }
 0x1de   : > { %v682_v34 = vld [vmem:[#allocation2 + $0x68] sm:$0xff]  ;;  %v687_v37 = vpack.c.bf16 %v674_v32, %v673_v31  ;;  %v692_v46 = vpack.c.bf16 %v684_v42, %v683_v41 }
 0x1df   : > { %v691_v38 = vpack.c.bf16 %v682_v34, %v681_v33 }
 0x1e1   : > { %917 = vmatmul.mubr.bf16.gmra.mrb[4].mxu0 %v1546_v35 }
 0x1e2   : > { %949 = vmatmul.mubr.bf16.gmra.mrb[4].mxu1 %v1547_v36  ;;  %924 = vmatprep.mubr.bf16.mxu0 %v687_v37 }
 0x1e3   : > { %956 = vmatprep.mubr.bf16.mxu1 %v691_v38 }
 0x1e9   : > { %925 = vmatmul.mubr.bf16.gmra.mrb[8].mxu0 %v1548_v43 }
 0x1ea   : > { %957 = vmatmul.mubr.bf16.gmra.mrb[8].mxu1 %v1549_v44  ;;  %932 = vmatprep.mubr.bf16.mxu0 %v688_v45 }
 0x1eb   : > { %964 = vmatprep.mubr.bf16.mxu1 %v692_v46 }
 0x1f1   : > { %933 = vmatmul.mubr.bf16.gmra.mrb[12].mxu0 %v1550_v47 }
 0x1f2   : > { %965 = vmatmul.mubr.bf16.gmra.mrb[12].mxu1 %v1551_v48 }
 0x2ac   : > { %v1247_v49 = vpop.f32.mrb[0].mxu0 }
 0x2ad   : > { %v1271_v50 = vpop.f32.mrb[0].mxu1  ;;  %v1248_v52 = vpop.f32.mrb[1].mxu0 }
 0x2ae   : > { %v1272_v53 = vpop.f32.mrb[1].mxu1  ;;  %v1249_v54 = vadd.f32 %v1248_v52, %v1247_v49  ;;  %v1250_v56 = vpop.f32.mrb[2].mxu0 }
 0x2af   : > { %v1273_v55 = vadd.f32 %v1272_v53, %v1271_v50  ;;  %v1274_v57 = vpop.f32.mrb[2].mxu1  ;;  %v1251_v58 = vpop.f32.mrb[3].mxu0 }
 0x2b0   : > { %v1275_v59 = vpop.f32.mrb[3].mxu1  ;;  %v911_v60 = vadd.f32 %v1249_v54, %v2275_v51  ;;  %v1252_v62 = vadd.f32 %v1251_v58, %v1250_v56 }
 0x2b1   : > { %v943_v61 = vadd.f32 %v1273_v55, %v2275_v51  ;;  %v1276_v63 = vadd.f32 %v1275_v59, %v1274_v57 }
 0x2b2   : > { %973 = vst [vmem:[%s2244_s11] sm:$0xff] %v911_v60  ;;  %v914_v0 = vadd.f32 %v1252_v62, %v2275_v51 }
 0x2b3   : > { %981 = vst [vmem:[%s2244_s11 + $0x40] sm:$0xff] %v943_v61  ;;  %v946_v1 = vadd.f32 %v1276_v63, %v2275_v51 }
 0x2b4   : > { %974 = vst [vmem:[%s2244_s11 + $0x8] sm:$0xff] %v914_v0  ;;  %v1253_v2 = vpop.f32.mrb[4].mxu0 }
 0x2b5   : > { %982 = vst [vmem:[%s2244_s11 + $0x48] sm:$0xff] %v946_v1  ;;  %v1277_v3 = vpop.f32.mrb[4].mxu1  ;;  %v1254_v4 = vpop.f32.mrb[5].mxu0 }
 0x2b6   : > { %v1278_v5 = vpop.f32.mrb[5].mxu1  ;;  %v1255_v6 = vadd.f32 %v1254_v4, %v1253_v2  ;;  %v1256_v8 = vpop.f32.mrb[6].mxu0 }
 0x2b7   : > { %v1279_v7 = vadd.f32 %v1278_v5, %v1277_v3  ;;  %v1280_v9 = vpop.f32.mrb[6].mxu1  ;;  %v1257_v10 = vpop.f32.mrb[7].mxu0 }
 0x2b8   : > { %v1281_v11 = vpop.f32.mrb[7].mxu1  ;;  %v919_v12 = vadd.f32 %v1255_v6, %v2275_v51  ;;  %v1258_v14 = vadd.f32 %v1257_v10, %v1256_v8 }
 0x2b9   : > { %v951_v13 = vadd.f32 %v1279_v7, %v2275_v51  ;;  %v1282_v15 = vadd.f32 %v1281_v11, %v1280_v9 }
 0x2ba   : > { %975 = vst [vmem:[%s2244_s11 + $0x10] sm:$0xff] %v919_v12  ;;  %v922_v16 = vadd.f32 %v1258_v14, %v2275_v51 }
 0x2bb   : > { %983 = vst [vmem:[%s2244_s11 + $0x50] sm:$0xff] %v951_v13  ;;  %v954_v17 = vadd.f32 %v1282_v15, %v2275_v51 }
 0x2bc   : > { %976 = vst [vmem:[%s2244_s11 + $0x18] sm:$0xff] %v922_v16  ;;  %v1259_v18 = vpop.f32.mrb[8].mxu0 }
 0x2bd   : > { %984 = vst [vmem:[%s2244_s11 + $0x58] sm:$0xff] %v954_v17  ;;  %v1283_v19 = vpop.f32.mrb[8].mxu1  ;;  %v1260_v20 = vpop.f32.mrb[9].mxu0 }
 0x2be   : > { %v1284_v21 = vpop.f32.mrb[9].mxu1  ;;  %v1261_v22 = vadd.f32 %v1260_v20, %v1259_v18  ;;  %v1262_v24 = vpop.f32.mrb[10].mxu0 }
 0x2bf   : > { %v1285_v23 = vadd.f32 %v1284_v21, %v1283_v19  ;;  %v1286_v25 = vpop.f32.mrb[10].mxu1  ;;  %v1263_v26 = vpop.f32.mrb[11].mxu0 }
 0x2c0   : > { %v1287_v27 = vpop.f32.mrb[11].mxu1  ;;  %v927_v28 = vadd.f32 %v1261_v22, %v2275_v51  ;;  %v1264_v30 = vadd.f32 %v1263_v26, %v1262_v24 }
 0x2c1   : > { %v959_v29 = vadd.f32 %v1285_v23, %v2275_v51  ;;  %v1288_v31 = vadd.f32 %v1287_v27, %v1286_v25 }
 0x2c2   : > { %977 = vst [vmem:[%s2244_s11 + $0x20] sm:$0xff] %v927_v28  ;;  %v930_v32 = vadd.f32 %v1264_v30, %v2275_v51 }
 0x2c3   : > { %985 = vst [vmem:[%s2244_s11 + $0x60] sm:$0xff] %v959_v29  ;;  %v962_v33 = vadd.f32 %v1288_v31, %v2275_v51 }
 0x2c4   : > { %978 = vst [vmem:[%s2244_s11 + $0x28] sm:$0xff] %v930_v32  ;;  %v1265_v34 = vpop.f32.mrb[12].mxu0 }
 0x2c5   : > { %986 = vst [vmem:[%s2244_s11 + $0x68] sm:$0xff] %v962_v33  ;;  %v1289_v35 = vpop.f32.mrb[12].mxu1  ;;  %v1266_v36 = vpop.f32.mrb[13].mxu0 }
 0x2c6   : > { %v1290_v37 = vpop.f32.mrb[13].mxu1  ;;  %v1267_v38 = vadd.f32 %v1266_v36, %v1265_v34  ;;  %v1268_v40 = vpop.f32.mrb[14].mxu0 }
 0x2c7   : > { %v1291_v39 = vadd.f32 %v1290_v37, %v1289_v35  ;;  %v1292_v41 = vpop.f32.mrb[14].mxu1  ;;  %v1269_v42 = vpop.f32.mrb[15].mxu0 }
 0x2c8   : > { %v1293_v43 = vpop.f32.mrb[15].mxu1  ;;  %v935_v44 = vadd.f32 %v1267_v38, %v2275_v51  ;;  %v1270_v46 = vadd.f32 %v1269_v42, %v1268_v40 }
 0x2c9   : > { %v967_v45 = vadd.f32 %v1291_v39, %v2275_v51  ;;  %v1294_v47 = vadd.f32 %v1293_v43, %v1292_v41 }
 0x2ca   : > { %979 = vst [vmem:[%s2244_s11 + $0x30] sm:$0xff] %v935_v44  ;;  %v938_v48 = vadd.f32 %v1270_v46, %v2275_v51 }
 0x2cb   : > { %987 = vst [vmem:[%s2244_s11 + $0x70] sm:$0xff] %v967_v45  ;;  %v970_v49 = vadd.f32 %v1294_v47, %v2275_v51 }
 0x2cc   : > { %980 = vst [vmem:[%s2244_s11 + $0x38] sm:$0xff] %v938_v48 }
 0x2cd   : > { %988 = vst [vmem:[%s2244_s11 + $0x78] sm:$0xff] %v970_v49 }
 0x2ce PF: > { %s2466_s21 = sld [smem:[#allocation19_spill]]  ;;  %s2467_s1 = sld [smem:[#allocation28_spill]] }
 0x2cf   : > { %s1003_s7 = sshll.u32 %s2244_s11, 4  ;;  %s990_s5 = scalar_lea.sflag [#allocation5], %s2230_s27  ;;  %s2316_s7 = int_to_ptr.vmem [resolvable:$true] %s1003_s7 }
 0x2d0   : > { %s1670_s28 = scalar_lea.vmem %s2316_s7, 2048  ;;  %p2468_p8 = scmp.ne.s32.totalorder %s2453_s15, 0 }
 0x2d1   : > { %p1671_p9 = scmp.ne.s32.totalorder %s2316_s7, %s1670_s28  ;;  %s1838_s9 = smov [#allocation11]  }
 0x2d2   : > { %s1674_s12 = sshll.u32 %s1838_s9, 4  ;;  %s1675_s12 = int_to_ptr.vmem [resolvable:$false] %s1674_s12 }
 0x2d3   : > { %p1672_p1 = pnand %p1671_p9, %p2468_p8  ;;  %s1676_s10 = scalar_lea.vmem %s1675_s12, 4096 }
 0x2d4   : > { %s1214_s0 = sshll.u32 %s2466_s21, 11  ;;  %p1677_p5 = scmp.lt.s32.totalorder %s2316_s7, %s1675_s12 }
 0x2d5   : > { %s2313_s14 = scalar_lea.hbm %s2467_s1, %s1214_s0  ;;  %p1673_p7 = pneg %p1672_p1 }
 0x2d6   : > { %p1678_p13 = scmp.lt.s32.totalorder %s1676_s10, %s1670_s28 }
 0x2d8   : > { %p1679_p11 = por %p1678_p13, %p1677_p5 }
 0x2da   : > { %p1680_p3 = pnand %p1679_p11, %p1673_p7 }
 0x2dc   : > { %1683 = shalt.err (!%p1680_p3)
}
 0x2dd   : > { %s1684_s11 = scalar_lea.hbm %s2313_s14, 2048  ;;  %s1688_s3 = scalar_lea.hbm %s2467_s1, 4096 }
 0x2de   : > { %p1685_p4 = scmp.ne.s32.totalorder %s2313_s14, %s1684_s11  ;;  %p1689_p6 = scmp.lt.u32.totalorder %s2313_s14, %s2467_s1 }
 0x2df   : > { %p1690_p12 = scmp.lt.u32.totalorder %s1688_s3, %s1684_s11  ;;  %p1692_p9 = scmp.lt.u32.totalorder %s1684_s11, %s2313_s14 }
 0x2e0   : > { %p1686_p2 = pnand %p1685_p4, %p2468_p8 }
 0x2e1   : > { %p1691_p0 = por %p1690_p12, %p1689_p6 }
 0x2e2   : > { %p1687_p10 = pneg %p1686_p2 }
 0x2e3   : > { %p1693_p1 = por %p1692_p9, %p1691_p0 }
 0x2e5   : > { %p1694_p7 = pnand %p1693_p1, %p1687_p10 }
 0x2e7   : > { %1697 = shalt.err (!%p1694_p7)
}
 0x2e8   : > { %s1839_s4 = smov 128   ;;  %s1840_s17 = smov 8  }
 0x2e9   : > { %1369 = dma.vmem_to_hbm [thread:$0]  (%p2468_p8), %s2316_s7, 2048, %s2313_s14, %s990_s5, %s1839_s4, %s1839_s4, %s1840_s17  }
 0x2ea PF: > { %p1392_p5 = scmp.ge.s32.totalorder %s1828_s6, 2  ;;  %s1018_s28 = sand.u32 1, %s1776_s18  }
 0x2eb   : > { %p2469_p13 = scmp.ne.s32.totalorder %s2454_s13, 0  ;;  %s1019_s9 = scalar_lea.sflag [#allocation5], %s1018_s28 }
 0x2ed   : > { %p1386_p11 = pnand %p1392_p5, %p2469_p13 }
 0x2ef   : > { %1771 = dma.done.wait (!%p1386_p11), %s1019_s9, 2048  }
 0x2f0   : > { %1773 = vsyncadd (!%p1386_p11), %s1019_s9, 4294965248  ;;  %s25_s6 = sadd.s32 1, %s1828_s6   ;;  %s2471_s15 = sld [smem:[#allocation17_spill]] }
 0x2f1   : > { %p2347_p3 = scmp.ge.s32.totalorder %s25_s6, 6   ;;  %s2472_s27 = sld [smem:[#allocation22_spill]] }
 0x2f2   : > { %s2473_s14 = smov %s2078_s23  ;;  %s2474_s13 = sld [smem:[#allocation20_spill]] }
 0x2f3   : > { %s2475_s7 = sld [smem:[#allocation21_spill]]  ;;  %s2476_s18 = smov %s1780_s19 }
 0x2f4   : > { %s2477_s19 = smov %s1784_s20  ;;  %s2478_s20 = smov %s2144_s24 }
 0x2f5   : > { %s2479_s21 = smov %s1792_s22  ;;  %s2482_s24 = smov %s1804_s25 }
 0x2f6   : > { %s2480_s22 = smov %s2471_s15  ;;  %s2483_s25 = smov %s1808_s26 }
 0x2f7   : > { %s2481_s23 = smov %s2472_s27  ;;  %s2484_s26 = smov %s2473_s14 }
 0x2f8   : > { %s2485_s27 = smov %s1820_s29  ;;  %s2486_s28 = smov %s1824_s30 }
 0x2f9   : > { %s2487_s29 = smov %s2474_s13  ;;  %s2488_s30 = smov %s2475_s7 }
 0x2fa   :  { %24 = sbr.rel (!%p2347_p3) target bundleno = 19 (0x13), region = 121 }
 0x301   :  { %1024 = vsyncpa [#allocation4], 1 }
 0x302   :  { %1026 = vsyncpa [#allocation4 + $0x1], 1 }
 0x303   :  { %1027 = vsyncpa [#allocation7], 1 }
 0x304   :  { %1029 = vsyncpa [#allocation7 + $0x1], 1 }
 0x305   :  { %1030 = vsyncpa [#allocation10], 1 }
 0x306   :  { %1031 = vsyncpa [#allocation5], 1 }
 0x307   :  { %1033 = vsyncpa [#allocation5 + $0x1], 1 }

</bundles_post_ra>
